<compile_context>
chip_gen: v7x
topology: tpu7x:2x2x1
jax: 0.10.0
libtpu: 0.0.40
codegen_flags: <defaults>
</compile_context>

<pallas_src>
import jax
import jax.numpy as jnp
from jax.experimental import pallas as pl
from jax.experimental.pallas import tpu as pltpu


def _dummy_classifier_kernel(pred_ref, out_ref):
    # forward(_) has no arithmetic: just materialize `predictions` into the
    # (distinct, non-aliased) output buffer.
    out_ref[...] = pred_ref[...]


def dummy_classifier_forward(x: jax.Array, predictions: jax.Array) -> jax.Array:
    """Pallas equivalent of DummyClasifier.forward: returns `predictions`.

    `x` mirrors the PyTorch signature but — exactly like the module — is never
    read, so it is not passed to the kernel and costs no HBM bandwidth.
    """
    del x  # forward(_) ignores its input entirely.

    ndim = predictions.ndim
    full_block = pl.BlockSpec(
        predictions.shape, lambda *_: (0,) * ndim
    )
    nbytes = predictions.size * predictions.dtype.itemsize

    return pl.pallas_call(
        _dummy_classifier_kernel,
        out_shape=jax.ShapeDtypeStruct(predictions.shape, predictions.dtype),
        in_specs=[full_block],
        out_specs=full_block,
        # Zero FLOPs; one read + one write of the predictions tensor.
        cost_estimate=pl.CostEstimate(
            flops=0, transcendentals=0, bytes_accessed=2 * nbytes
        ),
    )(predictions)


if __name__ == "__main__":
    key = jax.random.PRNGKey(0)
    k_pred, k_x = jax.random.split(key)

    batch, num_classes = 2, 8
    # Deterministic "stored predictions" (the module's constructor argument).
    predictions = jax.random.normal(k_pred, (batch, num_classes), dtype=jnp.float32)
    # Ignored input, NCHW-like to match the PyTorch forward signature.
    x = jax.random.normal(k_x, (2, 4, 16, 16), dtype=jnp.float32)

    out = dummy_classifier_forward(x, predictions)
    out = jax.block_until_ready(out)

    assert out.shape == predictions.shape and out.dtype == predictions.dtype
    assert bool(jnp.allclose(out, predictions))

    # Second call must also work (no donated/aliased buffer issues).
    out2 = jax.block_until_ready(dummy_classifier_forward(x, predictions))
    assert bool(jnp.allclose(out2, predictions))

    print("KERNEL_OK")
</pallas_src>

<mosaic_0001>
module attributes {stable_mosaic.version = 11 : i64} {
  func.func @_dummy_classifier_kernel(%arg0: memref<2x8xf32, #tpu.memory_space<vmem>>, %arg1: memref<2x8xf32, #tpu.memory_space<vmem>>) attributes {dimension_semantics = [], scalar_prefetch = 0 : i64, scratch_operands = 0 : i64, tpu.core_type = #tpu.core_type<tc>} {
    %c0 = arith.constant 0 : index
    %c0_0 = arith.constant 0 : index
    %0 = vector.load %arg0[%c0, %c0_0] : memref<2x8xf32, #tpu.memory_space<vmem>>, vector<2x8xf32>
    %c0_1 = arith.constant 0 : index
    %c0_2 = arith.constant 0 : index
    %1 = vector.load %arg1[%c0_1, %c0_2] : memref<2x8xf32, #tpu.memory_space<vmem>>, vector<2x8xf32>
    tpu.vector_store %arg1[%c0_1, %c0_2], %0 {strides = array<i32>} : memref<2x8xf32, #tpu.memory_space<vmem>>, vector<2x8xf32>,
    return
  }
}

</mosaic_0001>

<bundles_post_ra>
// kernel: tpu_custom_call.1
= control target key start
LH: loop header
LB: loop body
LE: loop exit
PB: predicated region body
PF: predicated region fallthrough
CT: control target
= control target key end

     0   :  { %6 = vsyncpa [#allocation3], 0  ;;  %s125_s0 = inlined_call_operand.hbm [shape: f32[2,8], index: 0, kind: input, shape index: {}]   ;;  %s126_s1 = inlined_call_operand.hbm [shape: f32[2,8], index: 1, kind: output, shape index: {}]  }
   0x1   :  { %7 = vsyncpa [#allocation4], 0  ;;  %s89_s6 = smov [#allocation2]   ;;  %s41_s10 = scalar_lea.hbm %s125_s0, 32 }
   0x2   :  { %s14_s7 = sshll.u32 %s89_s6, 4  ;;  %p42_p0 = scmp.ne.s32.totalorder %s125_s0, %s41_s10  ;;  %s15_s7 = int_to_ptr.vmem [resolvable:$true] %s14_s7 }
   0x3   :  { %p45_p1 = scmp.lt.u32.totalorder %s41_s10, %s125_s0 }
   0x5   :  { %p47_p2 = pnand %p45_p1, %p42_p0 }
   0x7   :  { %50 = shalt.err (!%p47_p2)
}
   0x8   :  { %s51_s15 = scalar_lea.vmem %s15_s7, 32  ;;  %p56_p4 = scmp.lt.s32.totalorder %s15_s7, %s15_s7 }
   0x9   :  { %p52_p3 = scmp.ne.s32.totalorder %s15_s7, %s51_s15  ;;  %p57_p5 = scmp.lt.s32.totalorder %s51_s15, %s51_s15 }
   0xb   :  { %p58_p6 = por %p57_p5, %p56_p4 }
   0xd   :  { %p59_p7 = pnand %p58_p6, %p52_p3 }
   0xf   :  { %62 = shalt.err (!%p59_p7)
}
  0x10   :  { %17 = dma.hbm_to_vmem [thread:$0]  %s125_s0, 32, %s15_s7, [#allocation3]  }
  0x11   :  { %85 = dma.done.wait [#allocation3], 32  }
  0x12   :  { %86 = vsyncadd [#allocation3], 4294967264  ;;  %s90_s18 = smov [#allocation5]   ;;  %vm22_vm0 = vcmask 58368   ;;  %v21_v0 = vld [vmem:[#allocation2] sm:$0x3] }
  0x13   :  { %s30_s19 = sshll.u32 %s90_s18, 4  ;;  %23 = vst.msk [vmem:[#allocation5] sm:$0x3] %vm22_vm0, %v21_v0  ;;  %s31_s19 = int_to_ptr.vmem [resolvable:$true] %s30_s19 }
  0x14   :  { %s63_s20 = scalar_lea.vmem %s31_s19, 32  ;;  %p68_p9 = scmp.lt.s32.totalorder %s31_s19, %s31_s19 }
  0x15   :  { %p64_p8 = scmp.ne.s32.totalorder %s31_s19, %s63_s20  ;;  %p69_p10 = scmp.lt.s32.totalorder %s63_s20, %s63_s20 }
  0x17   :  { %p70_p11 = por %p69_p10, %p68_p9 }
  0x19   :  { %p71_p12 = pnand %p70_p11, %p64_p8 }
  0x1b   :  { %74 = shalt.err (!%p71_p12)
}
  0x1c   :  { %s75_s23 = scalar_lea.hbm %s126_s1, 32 }
  0x1d   :  { %p76_p13 = scmp.ne.s32.totalorder %s126_s1, %s75_s23  ;;  %p79_p0 = scmp.lt.u32.totalorder %s75_s23, %s126_s1 }
  0x1f   :  { %p81_p1 = pnand %p79_p0, %p76_p13 }
  0x21   :  { %84 = shalt.err (!%p81_p1)
}
  0x22   :  { %33 = dma.vmem_to_hbm [thread:$0]  %s31_s19, 32, %s126_s1, [#allocation4]  }
  0x23   :  { %87 = dma.done.wait [#allocation4], 32  }
  0x24   :  { %88 = vsyncadd [#allocation4], 4294967264 }
  0x25   :  { %37 = vsyncpa [#allocation3], 1 }
  0x26   :  { %38 = vsyncpa [#allocation4], 1 }

</bundles_post_ra>
